<compile_context>
chip_gen: v5e
topology: v5e:2x2
jax: 0.10.0
libtpu: 0.0.40
codegen_flags: <defaults>
</compile_context>

<pallas_src>
import functools

import jax
import jax.numpy as jnp
from jax.experimental import pallas as pl
from jax.experimental.pallas import tpu as pltpu


# -----------------------------------------------------------------------------
# Kernel factory
# -----------------------------------------------------------------------------
def _make_weight_kernel(mode: str, param: float, feat_dim: int, lane_chunk: int):
    """mode in {'distance','distance_squared','distance_cubed',
                'distance_gaussian','f_norm','l1'}"""

    def chunk_body(in_ref, tgt_ref, out_ref, lo):
        lsl = pl.ds(lo, lane_chunk)                      # static, 128-aligned
        if mode == "l1":
            acc = None
            for k in range(feat_dim):
                xk = in_ref[k, :, lsl]                   # (V, Lc)
                yk = tgt_ref[k, :, lsl]                  # (T, Lc)
                term = jnp.abs(yk[:, None, :] - xk[None, :, :])   # (T, V, Lc)
                acc = term if acc is None else acc + term
            w = 1.0 / (acc + 1e-6)
        else:
            # ||x - y||^2 = ||x||^2 + ||y||^2 - 2<x,y>: one mul-add per k on
            # the big (T, V, Lc) slab instead of sub+square+add.
            xsq = ysq = cross = None
            for k in range(feat_dim):
                xk = in_ref[k, :, lsl]                   # (V, Lc)
                yk = tgt_ref[k, :, lsl]                  # (T, Lc)
                xs, ys = xk * xk, yk * yk
                ct = yk[:, None, :] * xk[None, :, :]     # (T, V, Lc)
                xsq = xs if xsq is None else xsq + xs
                ysq = ys if ysq is None else ysq + ys
                cross = ct if cross is None else cross + ct
            d2 = xsq[None, :, :] + ysq[:, None, :] - 2.0 * cross
            d2 = jnp.maximum(d2, 0.0)                    # guard fp cancellation
            if mode == "distance_squared":
                w = 1.0 / (d2 + 1e-6)
            elif mode == "distance_gaussian":
                # Parity with the torch reference: no epsilon in the denom.
                w = jnp.exp(-param * d2)                 # exp(-b*d^2), sqrt elided
            elif mode == "distance_cubed":
                w = 1.0 / (d2 * jnp.sqrt(d2) + 1e-6)     # d^3 = d2*sqrt(d2)
            else:  # 'distance', 'f_norm' — keep exact 1/(d + 1e-6) semantics
                w = 1.0 / (jnp.sqrt(d2) + 1e-6)

        # Per-target normalization over input views = sublane-axis reduce (XLU,
        # which has slack here), matching `weights / weights.sum()` in torch.
        denom = jnp.sum(w, axis=1, keepdims=True)        # (T, 1, Lc)
        out_ref[:, :, lsl] = (w * pl.reciprocal(denom, approx=False)
                              ).astype(out_ref.dtype)

    def kernel(in_ref, tgt_ref, out_ref):
        # in_ref : (K, V, Sb), tgt_ref: (K, T, Sb), out_ref: (T, V, Sb)
        sb = out_ref.shape[-1]
        for c in range(sb // lane_chunk):                # bounds vreg pressure
            chunk_body(in_ref, tgt_ref, out_ref, c * lane_chunk)

    return kernel


# -----------------------------------------------------------------------------
# Blocking heuristics (correctness-neutral)
# -----------------------------------------------------------------------------
def _tensorcores_per_chip() -> int:
    """v7x exposes 2 TensorCores per chip; v5e/v6e behave as 1 here."""
    try:
        kind = jax.devices()[0].device_kind.lower()
    except Exception:
        return 1
    return 2 if "v7" in kind else 1


def _scene_blocking(num_scenes: int, num_tc: int):
    """Return (padded_scene_count, scenes_per_block); both multiples of 128."""
    s_pad = pl.cdiv(num_scenes, 128) * 128
    if num_tc <= 1:
        # Single TensorCore: few big steps (per-step overhead ~0.35us dominates
        # this tiny kernel; VMEM at sb=2048, K=16 is only a few MiB).
        n_blocks = pl.cdiv(s_pad, 2048)
    else:
        # v7x: at least 2 (even count) blocks so both TensorCores get work.
        n_blocks = max(2, pl.cdiv(s_pad, 1024))
        n_blocks += n_blocks % 2
    sb = max(128, pl.cdiv(s_pad, n_blocks * 128) * 128)
    s_pad = pl.cdiv(s_pad, sb) * sb
    return s_pad, sb


def _lane_chunk(sb: int) -> int:
    """Largest lane chunk (<=512) dividing sb: keeps the (T, V, Lc) accumulator
    around <=16 vregs so the K=16 modes do not spill at large sb."""
    for c in (512, 384, 256, 128):
        if sb % c == 0:
            return c
    return sb


# -----------------------------------------------------------------------------
# Pairwise weights: (S, V, K) x (S, T, K) -> (S, V, T)
# -----------------------------------------------------------------------------
def _pairwise_weights(in_feats, tgt_feats, mode, param, num_tc):
    S, V, K = in_feats.shape
    T = tgt_feats.shape[1]
    s_pad, sb = _scene_blocking(S, num_tc)

    # Scenes -> lane axis.  These transposes/pads are traced inside the same
    # jit as the pallas_call, so XLA fuses them (with the feature extraction)
    # into a single copy per operand.
    x = jnp.transpose(in_feats.astype(jnp.float32), (2, 1, 0))    # (K, V, S)
    y = jnp.transpose(tgt_feats.astype(jnp.float32), (2, 1, 0))   # (K, T, S)
    if s_pad != S:
        x = jnp.pad(x, ((0, 0), (0, 0), (0, s_pad - S)))
        y = jnp.pad(y, ((0, 0), (0, 0), (0, s_pad - S)))

    # v7x with a single 128-lane scene block: fold the two target-view halves
    # onto a second copy of the scene lanes so the grid has 2 parallel blocks
    # (one per TensorCore).  Pure wrapper plumbing; kernel/specs are unchanged.
    t_fold = 2 if (num_tc >= 2 and s_pad // sb < 2 and T % 2 == 0) else 1
    t_k = T // t_fold
    if t_fold == 2:
        x = jnp.concatenate([x, x], axis=-1)                          # (K, V, 2*s_pad)
        y = jnp.concatenate([y[:, :t_k, :], y[:, t_k:, :]], axis=-1)  # (K, T/2, 2*s_pad)
    lanes = s_pad * t_fold

    kernel = _make_weight_kernel(mode, float(param), K, _lane_chunk(sb))

    out = pl.pallas_call(
        kernel,
        out_shape=jax.ShapeDtypeStruct((t_k, V, lanes), jnp.float32),
        grid=(lanes // sb,),
        in_specs=[
            pl.BlockSpec((K, V, sb), lambda i: (0, 0, i)),
            pl.BlockSpec((K, t_k, sb), lambda i: (0, 0, i)),
        ],
        # Output minor-2 dim is V (=8 for this model): dense (8,128) tiles and
        # unmasked lane-dense stores.
        out_specs=pl.BlockSpec((t_k, V, sb), lambda i: (0, 0, i)),
        compiler_params=pltpu.CompilerParams(dimension_semantics=("parallel",)),
    )(x, y)

    if t_fold == 2:
        out = jnp.concatenate([out[..., :s_pad], out[..., s_pad:]], axis=0)  # (T, V, s_pad)

    # Back to the module's (num_scenes, num_input_views, num_target_views).
    # TODO(synk): expose the kernel-native (T, V, S) layout to downstream
    # consumers to drop this (jit-fused) final transpose entirely.
    return jnp.transpose(out, (2, 1, 0))[:S]


@functools.partial(
    jax.jit, static_argnames=("mode", "param", "num_tc", "use_translation"))
def _cam_weights(input_poses, target_poses, *, mode, param, num_tc,
                 use_translation):
    """One fused jit: feature extraction + layout plumbing + Pallas kernel."""
    S, V = input_poses.shape[:2]
    T = target_poses.shape[1]
    if use_translation:
        in_f = input_poses[:, :, :3, 3]                   # (S, V, 3)
        tg_f = target_poses[:, :, :3, 3]                  # (S, T, 3)
    else:
        in_f = input_poses.reshape(S, V, 16)              # (S, V, 16)
        tg_f = target_poses.reshape(S, T, 16)             # (S, T, 16)
    return _pairwise_weights(in_f, tg_f, mode, param, num_tc)


# -----------------------------------------------------------------------------
# Module wrapper (dispatch mirrors cam_weighting.py::cam_weighting)
# -----------------------------------------------------------------------------
class DeterministicCamWeighter:
    """JAX/Pallas port of the deterministic camera-weighting wrapper."""

    _TRANSLATION_MODES = ("distance", "distance_squared", "distance_cubed")

    def __init__(self, method_name: str):
        self.method_name = method_name
        self._num_tc = _tensorcores_per_chip()

    def __call__(self, input_poses, target_poses):
        return self.forward(input_poses, target_poses)

    def forward(self, input_poses, target_poses):
        # input_poses: (S, V, 4, 4), target_poses: (S, T, 4, 4)
        input_poses = jnp.asarray(input_poses, jnp.float32)
        target_poses = jnp.asarray(target_poses, jnp.float32)
        S, V = input_poses.shape[0], input_poses.shape[1]
        T = target_poses.shape[1]
        name = self.method_name

        if name == "baseline_mean" or V < 2:
            # Constant weights; no kernel needed.
            return jnp.full((S, V, T), 1.0 / V, dtype=jnp.float32)

        if name in self._TRANSLATION_MODES:
            return _cam_weights(input_poses, target_poses, mode=name, param=0.0,
                                num_tc=self._num_tc, use_translation=True)
        if name.startswith("distance_gaussian_b="):
            b = float(name.split("=")[-1])
            return _cam_weights(input_poses, target_poses,
                                mode="distance_gaussian", param=b,
                                num_tc=self._num_tc, use_translation=True)
        if name == "f_norm_weighting":
            return _cam_weights(input_poses, target_poses, mode="f_norm",
                                param=0.0, num_tc=self._num_tc,
                                use_translation=False)
        if name == "l1_weighing":
            return _cam_weights(input_poses, target_poses, mode="l1",
                                param=0.0, num_tc=self._num_tc,
                                use_translation=False)

        # TODO(synk): error_weighing_alpha=*, rel_cam_poses_l2,
        # rel_cam_poses_f_norm (rotation-matrix products / acos) not ported.
        raise NotImplementedError(f"{name} cam weighting algo not implemented")


# -----------------------------------------------------------------------------
# Plain-JAX reference (mirrors the torch math) for sanity checks.
# -----------------------------------------------------------------------------
def _reference(method_name, input_poses, target_poses):
    S, V = input_poses.shape[:2]
    T = target_poses.shape[1]
    if method_name == "baseline_mean" or V < 2:
        return jnp.full((S, V, T), 1.0 / V, jnp.float32)
    if method_name in ("f_norm_weighting", "l1_weighing"):
        diff = target_poses[:, None, :, :, :] - input_poses[:, :, None, :, :]
        if method_name == "l1_weighing":
            d = jnp.abs(diff).sum((-1, -2))                       # (S, V, T)
        else:
            d = jnp.sqrt((diff ** 2).sum((-1, -2)))
        w = 1.0 / (d + 1e-6)
    else:
        in_locs = input_poses[:, :, :3, 3]                        # (S, V, 3)
        tgt_locs = target_poses[:, :, :3, 3]                      # (S, T, 3)
        d = jnp.sqrt(((tgt_locs[:, None] - in_locs[:, :, None]) ** 2).sum(-1))
        if method_name == "distance":
            w = 1.0 / (d + 1e-6)
        elif method_name == "distance_squared":
            w = 1.0 / (d ** 2 + 1e-6)
        elif method_name == "distance_cubed":
            w = 1.0 / (d ** 3 + 1e-6)
        elif method_name.startswith("distance_gaussian_b="):
            b = float(method_name.split("=")[-1])
            w = jnp.exp(-b * d ** 2)
        else:
            raise NotImplementedError(method_name)
    return w / jnp.sum(w, axis=1, keepdims=True)


if __name__ == "__main__":
    key = jax.random.PRNGKey(0)
    k1, k2 = jax.random.split(key)

    num_scenes, num_input_views, num_target_views = 2, 8, 4

    input_poses = jax.random.normal(
        k1, (num_scenes, num_input_views, 4, 4), dtype=jnp.float32)
    target_poses = jax.random.normal(
        k2, (num_scenes, num_target_views, 4, 4), dtype=jnp.float32)
    # Homogeneous bottom row [0, 0, 0, 1].
    bottom = jnp.array([0.0, 0.0, 0.0, 1.0], jnp.float32)
    input_poses = input_poses.at[:, :, 3, :].set(bottom)
    target_poses = target_poses.at[:, :, 3, :].set(bottom)

    methods = ["distance", "distance_squared", "distance_cubed",
               "distance_gaussian_b=0.5", "l1_weighing", "f_norm_weighting",
               "baseline_mean"]
    for name in methods:
        out = DeterministicCamWeighter(name)(input_poses, target_poses)
        out = jax.block_until_ready(out)
        assert out.shape == (num_scenes, num_input_views, num_target_views), (
            name, out.shape)
        ref = _reference(name, input_poses, target_poses)
        assert jnp.allclose(out, ref, rtol=3e-4, atol=1e-5), (
            f"mismatch: {name}, max|diff|={jnp.max(jnp.abs(out - ref))}")

    # Exercise the multi-block / padded-scene path with a larger scene count.
    k3, k4 = jax.random.split(k2)
    big_in = jax.random.normal(
        k3, (300, 8, 4, 4), jnp.float32).at[:, :, 3, :].set(bottom)
    big_tg = jax.random.normal(
        k4, (300, 4, 4, 4), jnp.float32).at[:, :, 3, :].set(bottom)
    for name in ("distance", "f_norm_weighting"):
        out = jax.block_until_ready(
            DeterministicCamWeighter(name)(big_in, big_tg))
        assert out.shape == (300, 8, 4), (name, out.shape)
        ref = _reference(name, big_in, big_tg)
        assert jnp.allclose(out, ref, rtol=3e-4, atol=1e-5), (
            f"mismatch (big): {name}, max|diff|={jnp.max(jnp.abs(out - ref))}")

    print("KERNEL_OK")
</pallas_src>

<mosaic_0001>
module attributes {stable_mosaic.version = 11 : i64} {
  func.func @kernel(%arg0: i32, %arg1: memref<3x8x128xf32, #tpu.memory_space<vmem>>, %arg2: memref<3x4x128xf32, #tpu.memory_space<vmem>>, %arg3: memref<4x8x128xf32, #tpu.memory_space<vmem>>) attributes {dimension_semantics = [#tpu.dimension_semantics<parallel>], iteration_bounds = array<i64: 1>, scalar_prefetch = 0 : i64, scratch_operands = 0 : i64, tpu.core_type = #tpu.core_type<tc>, window_params = [{transform_indices = @transform_0, window_bounds = array<i64: 3, 8, 128>}, {transform_indices = @transform_1, window_bounds = array<i64: 3, 4, 128>}, {transform_indices = @transform_2, window_bounds = array<i64: 4, 8, 128>}]} {
    %c0 = arith.constant 0 : index
    %c0_0 = arith.constant 0 : index
    %c0_1 = arith.constant 0 : index
    %0 = vector.load %arg1[%c0, %c0_0, %c0_1] : memref<3x8x128xf32, #tpu.memory_space<vmem>>, vector<1x8x128xf32>
    %1 = vector.shape_cast %0 : vector<1x8x128xf32> to vector<8x128xf32>
    %c0_2 = arith.constant 0 : index
    %c0_3 = arith.constant 0 : index
    %c0_4 = arith.constant 0 : index
    %2 = vector.load %arg2[%c0_2, %c0_3, %c0_4] : memref<3x4x128xf32, #tpu.memory_space<vmem>>, vector<1x4x128xf32>
    %3 = vector.shape_cast %2 : vector<1x4x128xf32> to vector<4x128xf32>
    %4 = arith.mulf %1, %1 : vector<8x128xf32>
    %5 = arith.mulf %3, %3 : vector<4x128xf32>
    %6 = vector.shape_cast %3 : vector<4x128xf32> to vector<4x1x128xf32>
    %7 = vector.shape_cast %1 : vector<8x128xf32> to vector<1x8x128xf32>
    %8 = vector.broadcast %6 : vector<4x1x128xf32> to vector<4x8x128xf32>
    %9 = vector.broadcast %7 : vector<1x8x128xf32> to vector<4x8x128xf32>
    %10 = arith.mulf %8, %9 : vector<4x8x128xf32>
    %c1 = arith.constant 1 : index
    %c0_5 = arith.constant 0 : index
    %c0_6 = arith.constant 0 : index
    %11 = vector.load %arg1[%c1, %c0_5, %c0_6] : memref<3x8x128xf32, #tpu.memory_space<vmem>>, vector<1x8x128xf32>
    %12 = vector.shape_cast %11 : vector<1x8x128xf32> to vector<8x128xf32>
    %c1_7 = arith.constant 1 : index
    %c0_8 = arith.constant 0 : index
    %c0_9 = arith.constant 0 : index
    %13 = vector.load %arg2[%c1_7, %c0_8, %c0_9] : memref<3x4x128xf32, #tpu.memory_space<vmem>>, vector<1x4x128xf32>
    %14 = vector.shape_cast %13 : vector<1x4x128xf32> to vector<4x128xf32>
    %15 = arith.mulf %12, %12 : vector<8x128xf32>
    %16 = arith.mulf %14, %14 : vector<4x128xf32>
    %17 = vector.shape_cast %14 : vector<4x128xf32> to vector<4x1x128xf32>
    %18 = vector.shape_cast %12 : vector<8x128xf32> to vector<1x8x128xf32>
    %19 = vector.broadcast %17 : vector<4x1x128xf32> to vector<4x8x128xf32>
    %20 = vector.broadcast %18 : vector<1x8x128xf32> to vector<4x8x128xf32>
    %21 = arith.mulf %19, %20 : vector<4x8x128xf32>
    %22 = arith.addf %4, %15 : vector<8x128xf32>
    %23 = arith.addf %5, %16 : vector<4x128xf32>
    %24 = arith.addf %10, %21 : vector<4x8x128xf32>
    %c2 = arith.constant 2 : index
    %c0_10 = arith.constant 0 : index
    %c0_11 = arith.constant 0 : index
    %25 = vector.load %arg1[%c2, %c0_10, %c0_11] : memref<3x8x128xf32, #tpu.memory_space<vmem>>, vector<1x8x128xf32>
    %26 = vector.shape_cast %25 : vector<1x8x128xf32> to vector<8x128xf32>
    %c2_12 = arith.constant 2 : index
    %c0_13 = arith.constant 0 : index
    %c0_14 = arith.constant 0 : index
    %27 = vector.load %arg2[%c2_12, %c0_13, %c0_14] : memref<3x4x128xf32, #tpu.memory_space<vmem>>, vector<1x4x128xf32>
    %28 = vector.shape_cast %27 : vector<1x4x128xf32> to vector<4x128xf32>
    %29 = arith.mulf %26, %26 : vector<8x128xf32>
    %30 = arith.mulf %28, %28 : vector<4x128xf32>
    %31 = vector.shape_cast %28 : vector<4x128xf32> to vector<4x1x128xf32>
    %32 = vector.shape_cast %26 : vector<8x128xf32> to vector<1x8x128xf32>
    %33 = vector.broadcast %31 : vector<4x1x128xf32> to vector<4x8x128xf32>
    %34 = vector.broadcast %32 : vector<1x8x128xf32> to vector<4x8x128xf32>
    %35 = arith.mulf %33, %34 : vector<4x8x128xf32>
    %36 = arith.addf %22, %29 : vector<8x128xf32>
    %37 = arith.addf %23, %30 : vector<4x128xf32>
    %38 = arith.addf %24, %35 : vector<4x8x128xf32>
    %39 = vector.shape_cast %36 : vector<8x128xf32> to vector<1x8x128xf32>
    %40 = vector.shape_cast %37 : vector<4x128xf32> to vector<4x1x128xf32>
    %41 = vector.broadcast %39 : vector<1x8x128xf32> to vector<4x8x128xf32>
    %42 = vector.broadcast %40 : vector<4x1x128xf32> to vector<4x8x128xf32>
    %43 = arith.addf %41, %42 : vector<4x8x128xf32>
    %cst = arith.constant 2.000000e+00 : f32
    %44 = vector.broadcast %cst : f32 to vector<4x8x128xf32>
    %45 = arith.mulf %44, %38 : vector<4x8x128xf32>
    %46 = arith.subf %43, %45 : vector<4x8x128xf32>
    %cst_15 = arith.constant 0.000000e+00 : f32
    %47 = vector.broadcast %cst_15 : f32 to vector<4x8x128xf32>
    %48 = arith.maximumf %46, %47 : vector<4x8x128xf32>
    %49 = math.sqrt %48 : vector<4x8x128xf32>
    %cst_16 = arith.constant 9.99999997E-7 : f32
    %50 = vector.broadcast %cst_16 : f32 to vector<4x8x128xf32>
    %51 = arith.addf %49, %50 : vector<4x8x128xf32>
    %cst_17 = arith.constant 1.000000e+00 : f32
    %52 = vector.broadcast %cst_17 : f32 to vector<4x8x128xf32>
    %53 = arith.divf %52, %51 : vector<4x8x128xf32>
    %cst_18 = arith.constant dense<0.000000e+00> : vector<4x128xf32>
    %54 = vector.multi_reduction <add>, %53, %cst_18 [1] : vector<4x8x128xf32> to vector<4x128xf32>
    %55 = vector.shape_cast %54 : vector<4x128xf32> to vector<4x1x128xf32>
    %56 = tpu.reciprocal %55 : vector<4x1x128xf32> -> vector<4x1x128xf32>
    %57 = vector.broadcast %56 : vector<4x1x128xf32> to vector<4x8x128xf32>
    %58 = arith.mulf %53, %57 : vector<4x8x128xf32>
    %c0_19 = arith.constant 0 : index
    %c0_20 = arith.constant 0 : index
    %c0_21 = arith.constant 0 : index
    %59 = vector.load %arg3[%c0_19, %c0_20, %c0_21] : memref<4x8x128xf32, #tpu.memory_space<vmem>>, vector<4x8x128xf32>
    tpu.vector_store %arg3[%c0_19, %c0_20, %c0_21], %58 {strides = array<i32>} : memref<4x8x128xf32, #tpu.memory_space<vmem>>, vector<4x8x128xf32>,
    return
  }
  func.func @transform_0(%arg0: i32) -> (i32, i32, i32) {
    %c0_i32 = arith.constant 0 : i32
    %c0_i32_0 = arith.constant 0 : i32
    %c0_i32_1 = arith.constant 0 : i32
    return %c0_i32, %c0_i32_0, %arg0 : i32, i32, i32
  }
  func.func @transform_1(%arg0: i32) -> (i32, i32, i32) {
    %c0_i32 = arith.constant 0 : i32
    %c0_i32_0 = arith.constant 0 : i32
    %c0_i32_1 = arith.constant 0 : i32
    return %c0_i32, %c0_i32_0, %arg0 : i32, i32, i32
  }
  func.func @transform_2(%arg0: i32) -> (i32, i32, i32) {
    %c0_i32 = arith.constant 0 : i32
    %c0_i32_0 = arith.constant 0 : i32
    %c0_i32_1 = arith.constant 0 : i32
    return %c0_i32, %c0_i32_0, %arg0 : i32, i32, i32
  }
}

</mosaic_0001>

<bundles_post_ra>
// kernel: _cam_weights.1
= control target key start
LH: loop header
LB: loop body
LE: loop exit
PB: predicated region body
PF: predicated region fallthrough
CT: control target
= control target key end

     0   :  { %s472_s0 = inlined_call_operand.vmem [shape: f32[3,8,128], index: 0, kind: input, shape index: {}]   ;;  %s473_s1 = inlined_call_operand.vmem [shape: f32[3,4,128], index: 1, kind: input, shape index: {}]   ;;  %s474_s2 = inlined_call_operand.vmem [shape: f32[4,8,128], index: 2, kind: output, shape index: {}]  }
   0x1   :  { %v11_v0 = vld [vmem:[%s472_s0] sm:$0xff]  ;;  %v319_v2 = vld [vmem:[%s472_s0 + $0x8] sm:$0xff]  ;;  %v321_v23 = vld [vmem:[%s472_s0 + $0x10] sm:$0xff] }
   0x2   :  { %v12_v1 = vld [vmem:[%s473_s1] sm:$0xf]  ;;  %v13_v3 = vmul.f32 %v11_v0, %v11_v0  ;;  %v320_v7 = vld [vmem:[%s473_s1 + $0x4] sm:$0xf]  ;;  %v35_v10 = vmul.f32 %v319_v2, %v319_v2  ;;  %v322_v24 = vld [vmem:[%s473_s1 + $0x8] sm:$0xf]  ;;  %v63_v34 = vmul.f32 %v321_v23, %v321_v23 }
   0x3   :  { %v14_v4 = vmul.f32 %v12_v1, %v12_v1  ;;  %v16_v5 = vrot.slane %v12_v1, 1  ;;  %v17_v6 = vrot.slane %v12_v1, 2  ;;  %v18_v8 = vrot.slane %v12_v1, 3 }
   0x4   :  { %v19_v9 = vperm.slane %v12_v1, 0  ;;  %v36_v11 = vmul.f32 %v320_v7, %v320_v7  ;;  %v38_v14 = vrot.slane %v320_v7, 1  ;;  %v39_v15 = vrot.slane %v320_v7, 2 }
   0x5   :  { %v20_v12 = vperm.slane %v16_v5, 0  ;;  %v21_v13 = vperm.slane %v17_v6, 0  ;;  %v22_v16 = vperm.slane %v18_v8, 0  ;;  %v40_v17 = vrot.slane %v320_v7, 3 }
   0x6   :  { %v41_v18 = vperm.slane %v320_v7, 0  ;;  %v27_v19 = vmul.f32 %v19_v9, %v11_v0  ;;  %v42_v21 = vperm.slane %v38_v14, 0  ;;  %v43_v22 = vperm.slane %v39_v15, 0 }
   0x7   :  { %v28_v20 = vmul.f32 %v20_v12, %v11_v0  ;;  %v29_v25 = vmul.f32 %v21_v13, %v11_v0  ;;  %v30_v26 = vmul.f32 %v22_v16, %v11_v0  ;;  %v44_v27 = vperm.slane %v40_v17, 0 }
   0x8   :  { %v49_v28 = vmul.f32 %v319_v2, %v41_v18  ;;  %v50_v29 = vmul.f32 %v319_v2, %v42_v21  ;;  %v51_v30 = vmul.f32 %v319_v2, %v43_v22  ;;  %v53_v31 = vadd.f32 %v35_v10, %v13_v3 }
   0x9   :  { %v54_v32 = vadd.f32 %v36_v11, %v14_v4  ;;  %v52_v33 = vmul.f32 %v319_v2, %v44_v27  ;;  %v64_v35 = vmul.f32 %v322_v24, %v322_v24  ;;  %v66_v36 = vrot.slane %v322_v24, 1 }
   0xa   :  { %v55_v37 = vadd.f32 %v49_v28, %v27_v19  ;;  %v67_v38 = vrot.slane %v322_v24, 2  ;;  %v68_v39 = vrot.slane %v322_v24, 3  ;;  %v56_v40 = vadd.f32 %v50_v29, %v28_v20 }
   0xb   :  { %v57_v41 = vadd.f32 %v51_v30, %v29_v25  ;;  %v69_v42 = vperm.slane %v322_v24, 0  ;;  %v70_v43 = vperm.slane %v66_v36, 0  ;;  %v58_v44 = vadd.f32 %v52_v33, %v30_v26 }
   0xc   :  { %v71_v45 = vperm.slane %v67_v38, 0  ;;  %v72_v46 = vperm.slane %v68_v39, 0  ;;  %v82_v47 = vadd.f32 %v64_v35, %v54_v32  ;;  %v81_v50 = vadd.f32 %v63_v34, %v53_v31 }
   0xd   :  { %v77_v48 = vmul.f32 %v321_v23, %v69_v42  ;;  %v78_v49 = vmul.f32 %v321_v23, %v70_v43 }
   0xe   :  { %v79_v51 = vmul.f32 %v321_v23, %v71_v45  ;;  %v80_v52 = vmul.f32 %v321_v23, %v72_v46  ;;  %v88_v53 = vrot.slane %v82_v47, 1  ;;  %v89_v54 = vrot.slane %v82_v47, 2 }
   0xf   :  { %v83_v55 = vadd.f32 %v77_v48, %v55_v37  ;;  %v84_v56 = vadd.f32 %v78_v49, %v56_v40  ;;  %v90_v57 = vrot.slane %v82_v47, 3  ;;  %v91_v58 = vperm.slane %v82_v47, 0 }
  0x10   :  { %v85_v59 = vadd.f32 %v79_v51, %v57_v41  ;;  %v86_v60 = vadd.f32 %v80_v52, %v58_v44  ;;  %v92_v61 = vperm.slane %v88_v53, 0  ;;  %v93_v62 = vperm.slane %v89_v54, 0 }
  0x11   :  { %v94_v63 = vperm.slane %v90_v57, 0  ;;  %v99_v0 = vadd.f32 %v91_v58, %v81_v50  ;;  %v103_v1 = vmul.f32 2.0, %v83_v55  ;;  %v104_v2 = vmul.f32 2.0, %v84_v56 }
  0x12   :  { %v100_v3 = vadd.f32 %v92_v61, %v81_v50  ;;  %v101_v4 = vadd.f32 %v93_v62, %v81_v50  ;;  %v105_v5 = vmul.f32 2.0, %v85_v59  ;;  %v106_v6 = vmul.f32 2.0, %v86_v60 }
  0x13   :  { %v102_v7 = vadd.f32 %v94_v63, %v81_v50  ;;  %v107_v8 = vsub.f32 %v99_v0, %v103_v1 }
  0x14   :  { %v108_v9 = vsub.f32 %v100_v3, %v104_v2  ;;  %v109_v10 = vsub.f32 %v101_v4, %v105_v5 }
  0x15   :  { %v110_v11 = vsub.f32 %v102_v7, %v106_v6  ;;  %v111_v12 = vmax.f32 %v107_v8, 0.0 }
  0x16   :  { %v112_v13 = vmax.f32 %v108_v9, 0.0  ;;  %v113_v14 = vmax.f32 %v109_v10, 0.0 }
  0x17   :  { %v114_v15 = vmax.f32 %v110_v11, 0.0  ;;  %323 = vrsqrt.f32 %v111_v12  ;;  %vm122_vm0 = vcmp.eq.f32.partialorder %v111_v12, inf  ;;  %vm124_vm1 = vcmp.eq.f32.partialorder %v111_v12, 0.0 }
  0x18   :  { %325 = vrsqrt.f32 %v112_v13  ;;  %v125_v35 = vand.u32 2147483648, %v111_v12  ;;  %vm134_vm2 = vcmp.eq.f32.partialorder %v112_v13, inf  ;;  %vm136_vm3 = vcmp.eq.f32.partialorder %v112_v13, 0.0 }
  0x19   :  { %327 = vrsqrt.f32 %v113_v14  ;;  %v137_v40 = vand.u32 2147483648, %v112_v13  ;;  %vm146_vm4 = vcmp.eq.f32.partialorder %v113_v14, inf  ;;  %vm148_vm5 = vcmp.eq.f32.partialorder %v113_v14, 0.0 }
  0x1a   :  { %329 = vrsqrt.f32 %v114_v15  ;;  %v149_v43 = vand.u32 2147483648, %v113_v14  ;;  %vm158_vm6 = vcmp.eq.f32.partialorder %v114_v15, inf  ;;  %v161_v47 = vand.u32 2147483648, %v114_v15 }
  0x1b   :  { %vm160_vm7 = vcmp.eq.f32.partialorder %v114_v15, 0.0 }
  0x1d   :  { %v324_v16 = vpop.eup %323 }
  0x1e   :  { %v326_v17 = vpop.eup %325  ;;  %v116_v18 = vmul.f32 %v324_v16, %v111_v12 }
  0x1f   :  { %v328_v19 = vpop.eup %327  ;;  %v128_v20 = vmul.f32 %v326_v17, %v112_v13 }
  0x20   :  { %v330_v21 = vpop.eup %329  ;;  %v117_v22 = vmul.f32 %v324_v16, %v116_v18  ;;  %v140_v23 = vmul.f32 %v328_v19, %v113_v14 }
  0x21   :  { %v129_v24 = vmul.f32 %v326_v17, %v128_v20  ;;  %v152_v25 = vmul.f32 %v330_v21, %v114_v15 }
  0x22   :  { %v118_v26 = vmul.f32 0.5, %v117_v22  ;;  %v141_v27 = vmul.f32 %v328_v19, %v140_v23 }
  0x23   :  { %v130_v28 = vmul.f32 0.5, %v129_v24  ;;  %v153_v29 = vmul.f32 %v330_v21, %v152_v25 }
  0x24   :  { %v119_v30 = vsub.f32 1.5, %v118_v26  ;;  %v142_v31 = vmul.f32 0.5, %v141_v27 }
  0x25   :  { %v131_v32 = vsub.f32 1.5, %v130_v28  ;;  %v154_v33 = vmul.f32 0.5, %v153_v29 }
  0x26   :  { %v120_v34 = vmul.f32 %v324_v16, %v119_v30  ;;  %v143_v36 = vsub.f32 1.5, %v142_v31 }
  0x27   :  { %v132_v37 = vmul.f32 %v326_v17, %v131_v32  ;;  %v155_v38 = vsub.f32 1.5, %v154_v33 }
  0x28   :  { %v121_v39 = vmul.f32 %v120_v34, %v111_v12  ;;  %v144_v41 = vmul.f32 %v328_v19, %v143_v36 }
  0x29   :  { %v133_v42 = vmul.f32 %v132_v37, %v112_v13  ;;  %v156_v44 = vmul.f32 %v330_v21, %v155_v38 }
  0x2a   :  { %v123_v45 = vsel %vm122_vm0, %v111_v12, %v121_v39  ;;  %v145_v46 = vmul.f32 %v144_v41, %v113_v14 }
  0x2b   :  { %v126_v48 = vsel %vm124_vm1, %v125_v35, %v123_v45  ;;  %v135_v49 = vsel %vm134_vm2, %v112_v13, %v133_v42  ;;  %v157_v50 = vmul.f32 %v156_v44, %v114_v15 }
  0x2c   :  { %v138_v51 = vsel %vm136_vm3, %v137_v40, %v135_v49  ;;  %v147_v52 = vsel %vm146_vm4, %v113_v14, %v145_v46  ;;  %v163_v53 = vadd.f32 1e-06, %v126_v48 }
  0x2d   :  { %v150_v54 = vsel %vm148_vm5, %v149_v43, %v147_v52  ;;  %v159_v55 = vsel %vm158_vm6, %v114_v15, %v157_v50  ;;  %v164_v56 = vadd.f32 1e-06, %v138_v51 }
  0x2e   :  { %v162_v57 = vsel %vm160_vm7, %v161_v47, %v159_v55  ;;  %v165_v58 = vadd.f32 1e-06, %v150_v54  ;;  %331 = vrcp.f32 %v163_v53  ;;  %v176_v60 = vand.u32 2147483647, %v163_v53 }
  0x2f   :  { %v166_v59 = vadd.f32 1e-06, %v162_v57  ;;  %333 = vrcp.f32 %v164_v56  ;;  %v178_v61 = vand.u32 2147483648, %v163_v53  ;;  %v193_v63 = vand.u32 2147483648, %v164_v56 }
  0x30   :  { %335 = vrcp.f32 %v165_v58  ;;  %vm172_vm8 = vweird.f32 %v163_v53  ;;  %vm187_vm9 = vweird.f32 %v164_v56  ;;  %v191_v2 = vand.u32 2147483647, %v164_v56 }
  0x31   :  { %337 = vrcp.f32 %v166_v59  ;;  %vm384_vm10 = vcmp.eq.f32.partialorder %v176_v60, 8.507059e+37  ;;  %v179_v5 = vor.u32 1.1754944e-38, %v178_v61  ;;  %vm202_vm11 = vweird.f32 %v165_v58 }
  0x32   :  { %v206_v9 = vand.u32 2147483647, %v165_v58  ;;  %v194_v12 = vor.u32 1.1754944e-38, %v193_v63  ;;  %v208_v13 = vand.u32 2147483648, %v165_v58  ;;  %vm217_vm0 = vweird.f32 %v166_v59 }
  0x33   :  { %v221_v19 = vand.u32 2147483647, %v166_v59  ;;  %v223_v20 = vand.u32 2147483648, %v166_v59  ;;  %vm192_vm3 = vcmp.eq.f32.partialorder %v191_v2, 8.507059e+37 }
  0x34   :  { %v332_v62 = vpop.eup %331  ;;  %v209_v27 = vor.u32 1.1754944e-38, %v208_v13  ;;  %vm207_vm5 = vcmp.eq.f32.partialorder %v206_v9, 8.507059e+37 }
  0x35   :  { %v334_v0 = vpop.eup %333  ;;  %v168_v1 = vmul.f32 %v332_v62, %v163_v53  ;;  %vm173_vm12 = vweird.f32 %v332_v62  ;;  %vm222_vm7 = vcmp.eq.f32.partialorder %v221_v19, 8.507059e+37  ;;  %v224_v33 = vor.u32 1.1754944e-38, %v223_v20 }
  0x36   :  { %v336_v3 = vpop.eup %335  ;;  %v183_v6 = vmul.f32 %v334_v0, %v164_v56  ;;  %vm188_vm13 = vweird.f32 %v334_v0  ;;  %vm389_vm15 = vmor %vm172_vm8, %vm173_vm12 }
  0x37   :  { %v169_v7 = vsub.f32 1.0, %v168_v1  ;;  %v198_v8 = vmul.f32 %v336_v3, %v165_v58  ;;  %v338_v10 = vpop.eup %337  ;;  %vm203_vm14 = vweird.f32 %v336_v3  ;;  %vm394_vm1 = vmor %vm187_vm9, %vm188_vm13 }
  0x38   :  { %v184_v11 = vsub.f32 1.0, %v183_v6  ;;  %v213_v16 = vmul.f32 %v338_v10, %v166_v59  ;;  %vm218_vm2 = vweird.f32 %v338_v10  ;;  %vm399_vm4 = vmor %vm202_vm11, %vm203_vm14 }
  0x39   :  { %v170_v14 = vmul.f32 %v332_v62, %v169_v7  ;;  %v199_v15 = vsub.f32 1.0, %v198_v8  ;;  %vm219_vm6 = vmor %vm217_vm0, %vm218_vm2 }
  0x3a   :  { %v185_v18 = vmul.f32 %v334_v0, %v184_v11  ;;  %v214_v24 = vsub.f32 1.0, %v213_v16 }
  0x3b   :  { %v171_v21 = vadd.f32 %v332_v62, %v170_v14  ;;  %v200_v23 = vmul.f32 %v336_v3, %v199_v15 }
  0x3c   :  { %v186_v25 = vadd.f32 %v334_v0, %v185_v18  ;;  %v215_v30 = vmul.f32 %v338_v10, %v214_v24 }
  0x3d   :  { %v175_v28 = vsel %vm389_vm15, %v332_v62, %v171_v21  ;;  %v201_v29 = vadd.f32 %v336_v3, %v200_v23 }
  0x3e   :  { %v407_v31 = vsel %vm384_vm10, %v179_v5, %v175_v28  ;;  %v190_v32 = vsel %vm394_vm1, %v334_v0, %v186_v25  ;;  %v216_v36 = vadd.f32 %v338_v10, %v215_v30 }
  0x3f   :  { %v412_v34 = vsel %vm192_vm3, %v194_v12, %v190_v32  ;;  %v205_v35 = vsel %vm399_vm4, %v336_v3, %v201_v29  ;;  %v227_v37 = vrot.slane %v407_v31, 4 }
  0x40   :  { %v417_v38 = vsel %vm207_vm5, %v209_v27, %v205_v35  ;;  %v233_v39 = vrot.slane %v412_v34, 4  ;;  %v220_v40 = vsel %vm219_vm6, %v338_v10, %v216_v36 }
  0x41   :  { %v228_v41 = vadd.f32 %v227_v37, %v407_v31  ;;  %v239_v42 = vrot.slane %v417_v38, 4  ;;  %v422_v43 = vsel %vm222_vm7, %v224_v33, %v220_v40 }
  0x42   :  { %v234_v44 = vadd.f32 %v233_v39, %v412_v34  ;;  %v245_v47 = vrot.slane %v422_v43, 4 }
  0x43   :  { %v229_v45 = vrot.slane %v228_v41, 2  ;;  %v240_v46 = vadd.f32 %v239_v42, %v417_v38 }
  0x44   :  { %v235_v48 = vrot.slane %v234_v44, 2  ;;  %v246_v51 = vadd.f32 %v245_v47, %v422_v43 }
  0x45   :  { %v230_v49 = vadd.f32 %v229_v45, %v228_v41  ;;  %v241_v50 = vrot.slane %v240_v46, 2 }
  0x46   :  { %v236_v52 = vadd.f32 %v235_v48, %v234_v44  ;;  %v247_v55 = vrot.slane %v246_v51, 2 }
  0x47   :  { %v231_v53 = vrot.slane %v230_v49, 1  ;;  %v242_v54 = vadd.f32 %v241_v50, %v240_v46 }
  0x48   :  { %v237_v56 = vrot.slane %v236_v52, 1  ;;  %v248_v59 = vadd.f32 %v247_v55, %v246_v51 }
  0x49   :  { %v232_v57 = vadd.f32 %v231_v53, %v230_v49  ;;  %v243_v58 = vrot.slane %v242_v54, 1 }
  0x4a   :  { %v238_v60 = vadd.f32 %v237_v56, %v236_v52  ;;  %v249_v62 = vrot.slane %v248_v59, 1 }
  0x4b   :  { %v244_v61 = vadd.f32 %v243_v58, %v242_v54  ;;  %339 = vrcp.f32 %v232_v57  ;;  %v260_v0 = vand.u32 2147483647, %v232_v57  ;;  %v262_v1 = vand.u32 2147483648, %v232_v57 }
  0x4c   :  { %341 = vrcp.f32 %v238_v60  ;;  %v250_v63 = vadd.f32 %v249_v62, %v248_v59  ;;  %v276_v3 = vand.u32 2147483648, %v238_v60  ;;  %vm256_vm8 = vweird.f32 %v232_v57 }
  0x4d   :  { %343 = vrcp.f32 %v244_v61  ;;  %vm270_vm9 = vweird.f32 %v238_v60  ;;  %v274_v6 = vand.u32 2147483647, %v238_v60  ;;  %vm428_vm10 = vcmp.eq.f32.partialorder %v260_v0, 8.507059e+37 }
  0x4e   :  { %345 = vrcp.f32 %v250_v63  ;;  %v263_v9 = vor.u32 1.1754944e-38, %v262_v1  ;;  %vm284_vm11 = vweird.f32 %v244_v61  ;;  %v288_v13 = vand.u32 2147483647, %v244_v61 }
  0x4f   :  { %v277_v16 = vor.u32 1.1754944e-38, %v276_v3  ;;  %v290_v17 = vand.u32 2147483648, %v244_v61  ;;  %vm298_vm0 = vweird.f32 %v250_v63  ;;  %v302_v23 = vand.u32 2147483647, %v250_v63 }
  0x50   :  { %v304_v24 = vand.u32 2147483648, %v250_v63  ;;  %vm275_vm3 = vcmp.eq.f32.partialorder %v274_v6, 8.507059e+37  ;;  %vm289_vm5 = vcmp.eq.f32.partialorder %v288_v13, 8.507059e+37 }
  0x51   :  { %v340_v2 = vpop.eup %339  ;;  %v291_v32 = vor.u32 1.1754944e-38, %v290_v17  ;;  %vm303_vm7 = vcmp.eq.f32.partialorder %v302_v23, 8.507059e+37 }
  0x52   :  { %v342_v4 = vpop.eup %341  ;;  %v252_v5 = vmul.f32 %v340_v2, %v232_v57  ;;  %vm257_vm12 = vweird.f32 %v340_v2  ;;  %v305_v40 = vor.u32 1.1754944e-38, %v304_v24 }
  0x53   :  { %v344_v7 = vpop.eup %343  ;;  %v266_v10 = vmul.f32 %v342_v4, %v238_v60  ;;  %vm271_vm13 = vweird.f32 %v342_v4  ;;  %vm433_vm15 = vmor %vm256_vm8, %vm257_vm12 }
  0x54   :  { %v253_v11 = vsub.f32 1.0, %v252_v5  ;;  %v280_v12 = vmul.f32 %v344_v7, %v244_v61  ;;  %v346_v14 = vpop.eup %345  ;;  %vm285_vm14 = vweird.f32 %v344_v7  ;;  %vm438_vm1 = vmor %vm270_vm9, %vm271_vm13 }
  0x55   :  { %v267_v15 = vsub.f32 1.0, %v266_v10  ;;  %v294_v20 = vmul.f32 %v346_v14, %v250_v63  ;;  %vm299_vm2 = vweird.f32 %v346_v14  ;;  %vm443_vm4 = vmor %vm284_vm11, %vm285_vm14 }
  0x56   :  { %v254_v18 = vmul.f32 %v340_v2, %v253_v11  ;;  %v281_v19 = vsub.f32 1.0, %v280_v12  ;;  %vm300_vm6 = vmor %vm298_vm0, %vm299_vm2 }
  0x57   :  { %v268_v22 = vmul.f32 %v342_v4, %v267_v15  ;;  %v295_v28 = vsub.f32 1.0, %v294_v20 }
  0x58   :  { %v255_v25 = vadd.f32 %v340_v2, %v254_v18  ;;  %v282_v27 = vmul.f32 %v344_v7, %v281_v19 }
  0x59   :  { %v269_v29 = vadd.f32 %v342_v4, %v268_v22  ;;  %v296_v36 = vmul.f32 %v346_v14, %v295_v28 }
  0x5a   :  { %v259_v33 = vsel %vm433_vm15, %v340_v2, %v255_v25  ;;  %v283_v35 = vadd.f32 %v344_v7, %v282_v27 }
  0x5b   :  { %v264_v37 = vsel %vm428_vm10, %v263_v9, %v259_v33  ;;  %v273_v39 = vsel %vm438_vm1, %v342_v4, %v269_v29  ;;  %v297_v44 = vadd.f32 %v346_v14, %v296_v36 }
  0x5c   :  { %v278_v41 = vsel %vm275_vm3, %v277_v16, %v273_v39  ;;  %v287_v42 = vsel %vm443_vm4, %v344_v7, %v283_v35  ;;  %v307_v45 = vmul.f32 %v264_v37, %v407_v31 }
  0x5d   :  { %v292_v46 = vsel %vm289_vm5, %v291_v32, %v287_v42  ;;  %v308_v47 = vmul.f32 %v278_v41, %v412_v34  ;;  %v301_v48 = vsel %vm300_vm6, %v346_v14, %v297_v44 }
  0x5e   :  { %v309_v49 = vmul.f32 %v292_v46, %v417_v38  ;;  %311 = vst [vmem:[%s474_s2] sm:$0xff] %v307_v45  ;;  %v306_v50 = vsel %vm303_vm7, %v305_v40, %v301_v48 }
  0x5f   :  { %312 = vst [vmem:[%s474_s2 + $0x8] sm:$0xff] %v308_v47  ;;  %v310_v51 = vmul.f32 %v306_v50, %v422_v43 }
  0x60   :  { %313 = vst [vmem:[%s474_s2 + $0x10] sm:$0xff] %v309_v49 }
  0x61   :  { %314 = vst [vmem:[%s474_s2 + $0x18] sm:$0xff] %v310_v51 }

</bundles_post_ra>
